<compile_context>
chip_gen: v6e
topology: v6e:2x2x1
jax: 0.10.0
libtpu: 0.0.40
codegen_flags: <defaults>
</compile_context>

<pallas_src>
import math

import jax
import jax.numpy as jnp
from jax.experimental import pallas as pl
from jax.experimental.pallas import tpu as pltpu

NUM_CLASSES = 7


def _doc_type_kernel(x_ref, wt_ref, b_ref, o_ref):
    # x_ref : (TM, H)  tile of flattened hidden states
    # wt_ref: (H, 7)   W^T (VMEM-resident across all tiles)
    # b_ref : (1, 7)   bias (VMEM-resident)
    # o_ref : (TM, 7)  logits tile
    logits = jnp.dot(x_ref[...], wt_ref[...], preferred_element_type=jnp.float32)
    o_ref[...] = (logits + b_ref[...]).astype(o_ref.dtype)


def _choose_tm(M, H, itemsize):
    """Pick the M-tile size: target 512 rows, bounded so one x buffer <= 8 MiB.

    With double buffering that keeps the x stream at <= 16 MiB of VMEM, which fits the
    scoped limit on all of v5e / v6e / v7x (plus tiny resident W^T / bias / output).
    """
    if M <= 512:
        return M  # single full block along M (block dim == full dim, always legal)
    per_buf_cap = 8 * 1024 * 1024
    tm = 512
    while tm > 8 and tm * H * itemsize > per_buf_cap:
        tm //= 2
    return max(8, tm)  # multiple of 8 -> satisfies sublane tiling rule


def document_type_predictor(encoder_last_hidden_state, weight, bias):
    """Pallas implementation of DocumentTypePredictor.forward.

    encoder_last_hidden_state: (B, S, H) float32
    weight: (7, H) float32   (PyTorch nn.Linear layout)
    bias:   (7,)  float32
    returns: (B, S, 7) float32
    """
    B, S, H = encoder_last_hidden_state.shape
    M = B * S

    x2d = encoder_last_hidden_state.reshape(M, H)
    wt = weight.T                        # (H, 7) — tiny relayout, done once per call
    b2d = bias.reshape(1, NUM_CLASSES)   # (1, 7)

    itemsize = jnp.dtype(x2d.dtype).itemsize
    TM = _choose_tm(M, H, itemsize)
    grid_m = pl.cdiv(M, TM)

    cost = pl.CostEstimate(
        flops=2 * M * H * NUM_CLASSES,
        transcendentals=0,
        bytes_accessed=(M * H + H * NUM_CLASSES) * itemsize
        + NUM_CLASSES * itemsize
        + M * NUM_CLASSES * 4,
    )

    out = pl.pallas_call(
        _doc_type_kernel,
        out_shape=jax.ShapeDtypeStruct((M, NUM_CLASSES), jnp.float32),
        grid_spec=pltpu.PrefetchScalarGridSpec(
            num_scalar_prefetch=0,
            grid=(grid_m,),
            in_specs=[
                pl.BlockSpec((TM, H), lambda i: (i, 0)),              # streamed x tiles
                pl.BlockSpec((H, NUM_CLASSES), lambda i: (0, 0)),     # resident W^T
                pl.BlockSpec((1, NUM_CLASSES), lambda i: (0, 0)),     # resident bias
            ],
            out_specs=pl.BlockSpec((TM, NUM_CLASSES), lambda i: (i, 0)),
        ),
        compiler_params=pltpu.CompilerParams(
            dimension_semantics=("parallel",),       # shard M tiles across TCs on v7x
            vmem_limit_bytes=32 * 1024 * 1024,       # above v5e's 16 MiB default scoped
        ),
        cost_estimate=cost,
    )(x2d, wt, b2d)

    logits = out.reshape(B, S, NUM_CLASSES)
    # torch.squeeze(logits, dim=-1): last dim is 7, so this is a no-op.
    return logits


def init_params(hidden_size, key):
    """Deterministic parameter init matching the PyTorch module's init scheme."""
    k_w, k_b = jax.random.split(key)
    # Xavier (Glorot) uniform for weight: U(-a, a), a = sqrt(6/(fan_in+fan_out))
    a = math.sqrt(6.0 / (hidden_size + NUM_CLASSES))
    weight = jax.random.uniform(
        k_w, (NUM_CLASSES, hidden_size), jnp.float32, minval=-a, maxval=a)
    # nn.Linear default bias init: U(-1/sqrt(fan_in), 1/sqrt(fan_in))
    bb = 1.0 / math.sqrt(hidden_size)
    bias = jax.random.uniform(
        k_b, (NUM_CLASSES,), jnp.float32, minval=-bb, maxval=bb)
    return weight, bias


if __name__ == "__main__":
    key = jax.random.PRNGKey(0)
    k_x, k_p, k_x2 = jax.random.split(key, 3)

    # Primary small-shape check (single tile path).
    batch, seq, hidden = 2, 8, 32
    x = jax.random.normal(k_x, (batch, seq, hidden), jnp.float32)
    weight, bias = init_params(hidden, k_p)

    logits = document_type_predictor(x, weight, bias)
    jax.block_until_ready(logits)

    ref = x @ weight.T + bias
    assert logits.shape == (batch, seq, NUM_CLASSES), logits.shape
    assert jnp.allclose(logits, ref, atol=1e-5, rtol=1e-5), "mismatch vs reference"

    # Secondary check exercising the tiled/multi-block path with a partial edge tile
    # (M = 600 > TM = 512, so grid = 2 with a masked final tile).
    b2, s2, h2 = 2, 300, 128
    x_big = jax.random.normal(k_x2, (b2, s2, h2), jnp.float32)
    w_big, bias_big = init_params(h2, k_p)
    logits_big = document_type_predictor(x_big, w_big, bias_big)
    jax.block_until_ready(logits_big)
    ref_big = x_big @ w_big.T + bias_big
    assert logits_big.shape == (b2, s2, NUM_CLASSES), logits_big.shape
    assert jnp.allclose(logits_big, ref_big, atol=1e-4, rtol=1e-4), "mismatch (tiled)"

    print("KERNEL_OK")
</pallas_src>

<mosaic_0001>
module attributes {stable_mosaic.version = 11 : i64} {
  func.func @_doc_type_kernel(%arg0: i32, %arg1: memref<16x32xf32, #tpu.memory_space<vmem>>, %arg2: memref<32x7xf32, #tpu.memory_space<vmem>>, %arg3: memref<1x7xf32, #tpu.memory_space<vmem>>, %arg4: memref<16x7xf32, #tpu.memory_space<vmem>>) attributes {dimension_semantics = [#tpu.dimension_semantics<parallel>], iteration_bounds = array<i64: 1>, scalar_prefetch = 0 : i64, scratch_operands = 0 : i64, tpu.core_type = #tpu.core_type<tc>, window_params = [{transform_indices = @transform_0, window_bounds = array<i64: 16, 32>}, {pipeline_mode = #tpu.pipeline_mode<synchronous>, transform_indices = @transform_1, window_bounds = array<i64: 32, 7>}, {pipeline_mode = #tpu.pipeline_mode<synchronous>, transform_indices = @transform_2, window_bounds = array<i64: 1, 7>}, {transform_indices = @transform_3, window_bounds = array<i64: 16, 7>}]} {
    %c0 = arith.constant 0 : index
    %c0_0 = arith.constant 0 : index
    %0 = vector.load %arg1[%c0, %c0_0] : memref<16x32xf32, #tpu.memory_space<vmem>>, vector<16x32xf32>
    %c0_1 = arith.constant 0 : index
    %c0_2 = arith.constant 0 : index
    %1 = vector.load %arg2[%c0_1, %c0_2] : memref<32x7xf32, #tpu.memory_space<vmem>>, vector<32x7xf32>
    %cst = arith.constant dense<0.000000e+00> : vector<16x7xf32>
    %2 = tpu.matmul %0, %1, %cst {dimension_numbers = #tpu.dot_dimension_numbers<[1], [0], [0], [1], [0, 0, 1, 1], [], []>} : vector<16x32xf32>, vector<32x7xf32>, vector<16x7xf32> -> vector<16x7xf32>
    %c0_3 = arith.constant 0 : index
    %c0_4 = arith.constant 0 : index
    %3 = vector.load %arg3[%c0_3, %c0_4] : memref<1x7xf32, #tpu.memory_space<vmem>>, vector<1x7xf32>
    %4 = vector.broadcast %3 : vector<1x7xf32> to vector<16x7xf32>
    %5 = arith.addf %2, %4 : vector<16x7xf32>
    %c0_5 = arith.constant 0 : index
    %c0_6 = arith.constant 0 : index
    %6 = vector.load %arg4[%c0_5, %c0_6] : memref<16x7xf32, #tpu.memory_space<vmem>>, vector<16x7xf32>
    tpu.vector_store %arg4[%c0_5, %c0_6], %5 {strides = array<i32>} : memref<16x7xf32, #tpu.memory_space<vmem>>, vector<16x7xf32>,
    return
  }
  func.func @transform_0(%arg0: i32) -> (i32, i32) {
    %c0_i32 = arith.constant 0 : i32
    %c0_i32_0 = arith.constant 0 : i32
    return %arg0, %c0_i32 : i32, i32
  }
  func.func @transform_1(%arg0: i32) -> (i32, i32) {
    %c0_i32 = arith.constant 0 : i32
    %c0_i32_0 = arith.constant 0 : i32
    %c0_i32_1 = arith.constant 0 : i32
    return %c0_i32, %c0_i32_0 : i32, i32
  }
  func.func @transform_2(%arg0: i32) -> (i32, i32) {
    %c0_i32 = arith.constant 0 : i32
    %c0_i32_0 = arith.constant 0 : i32
    %c0_i32_1 = arith.constant 0 : i32
    return %c0_i32, %c0_i32_0 : i32, i32
  }
  func.func @transform_3(%arg0: i32) -> (i32, i32) {
    %c0_i32 = arith.constant 0 : i32
    %c0_i32_0 = arith.constant 0 : i32
    return %arg0, %c0_i32 : i32, i32
  }
}

</mosaic_0001>

<bundles_post_ra>
// kernel: tpu_custom_call.1
= control target key start
LH: loop header
LB: loop body
LE: loop exit
PB: predicated region body
PF: predicated region fallthrough
CT: control target
= control target key end

     0   :  { %vm27_vm0 = vcmask 261120   ;;  %vm109_vm1 = vcmask 56320   ;;  %s185_s1 = inlined_call_operand.vmem [shape: f32[32,7], index: 1, kind: input, shape index: {}]   ;;  %s186_s0 = inlined_call_operand.vmem [shape: f32[16,32], index: 0, kind: input, shape index: {}]   ;;  %s187_s2 = inlined_call_operand.vmem [shape: f32[1,7], index: 2, kind: input, shape index: {}]   ;;  %s188_s3 = inlined_call_operand.vmem [shape: f32[16,7], index: 3, kind: output, shape index: {}]  }
   0x1   :  { %v19_v0 = vld [vmem:[%s185_s1 + $0x18] sm:$0xff]  ;;  %v18_v1 = vld [vmem:[%s185_s1 + $0x10] sm:$0xff]  ;;  %v14_v2 = vld [vmem:[%s186_s0] sm:$0xff] }
   0x2   :  { %125 = vmatprep.subr.mxu0 %v19_v0  ;;  %v17_v3 = vld [vmem:[%s185_s1 + $0x8] sm:$0xff]  ;;  %133 = vmatprep.mubr.msk.f32.mxu0 %vm27_vm0, %v14_v2  ;;  %v16_v4 = vld [vmem:[%s185_s1] sm:$0xff] }
   0x3   :  { %126 = vmatpush3.msra.mxu0 %v19_v0  ;;  %v15_v5 = vld [vmem:[%s186_s0 + $0x8] sm:$0xff]  ;;  %v116_v6 = vld [vmem:[%s187_s2] ss:$0 sm:$0xff] }
   0x4   :  { %127 = vmatprep.subr.mxu0 %v18_v1 }
   0x5   :  { %128 = vmatpush3.msra.mxu0 %v18_v1 }
   0x6   :  { %129 = vmatprep.subr.mxu0 %v17_v3 }
   0x7   :  { %130 = vmatpush3.msra.mxu0 %v17_v3 }
   0x8   :  { %131 = vmatprep.subr.mxu0 %v16_v4 }
   0x9   :  { %132 = vmatpush3.msra.mxu0 %v16_v4 }
   0xa   :  { %134 = vmatmul.mubr.msk.f32.vlgmr.msra.gmra.mxu0 %vm27_vm0, %v15_v5 }
  0xca   :  { %v135_v7 = vpop.f32.mrf.mxu0 }
  0xcb   :  { %v106_v8 = vadd.f32 %v135_v7, %v116_v6 }
  0xcc   :  { %v100_v9 = vpop.f32.mrf.mxu0 }
  0xcd   :  { %111 = vst.msk [vmem:[%s188_s3 + $0x8] sm:$0xff] %vm109_vm1, %v106_v8  ;;  %v101_v10 = vadd.f32 %v116_v6, %v100_v9 }
  0xcf   :  { %110 = vst.msk [vmem:[%s188_s3] sm:$0xff] %vm109_vm1, %v101_v10 }

</bundles_post_ra>
